<compile_context>
chip_gen: v7x
topology: tpu7x:2x2x1
jax: 0.10.0
libtpu: 0.0.40
codegen_flags: <defaults>
</compile_context>

<pallas_src>
import functools

import jax
import jax.numpy as jnp
from jax.experimental import pallas as pl
from jax.experimental.pallas import tpu as pltpu  # noqa: F401  (TPU backend)


LANE = 128      # pad feature dims to this so stores are unmasked / lane-dense
SUBLANE = 8     # batch must be a multiple of this for clean sublane layout


# ----------------------------------------------------------------------------
# Fake-quantization (matches DMSQQuantizer.calculate_scaling / quantize_tensor
# / dequantize_tensor).  Used inside both kernels.
# ----------------------------------------------------------------------------
def _fake_quant(t, bits, valid_cols=None):
    qmin = float(-(2 ** (bits - 1)))
    qmax = float(2 ** (bits - 1) - 1)
    if valid_cols is None or valid_cols == t.shape[-1]:
        t_min = jnp.min(t)
        t_max = jnp.max(t)
    else:
        # Range over the real lanes only; the remaining lanes are zero padding
        # added purely for lane-dense layout and must not affect the range.
        col = jax.lax.broadcasted_iota(jnp.int32, t.shape, t.ndim - 1)
        valid = col < valid_cols
        t_min = jnp.min(jnp.where(valid, t, jnp.inf))
        t_max = jnp.max(jnp.where(valid, t, -jnp.inf))
    rng = t_max - t_min
    # torch: scale = (max - min) / (qmax - qmin).  Guard the constant-tensor
    # case (scale == 0 -> div-by-zero) by passing the tensor through unchanged.
    scale = jnp.where(rng > 0.0, rng / (qmax - qmin), 1.0)
    zero_point = jnp.round(qmin - t_min / scale)
    q = jnp.clip(jnp.round(t / scale + zero_point), qmin, qmax)
    dq = scale * (q - zero_point)
    return jnp.where(rng > 0.0, dq, t)


# ----------------------------------------------------------------------------
# quantize_model(): one-time weight fake-quant kernel (off the hot path).
# ----------------------------------------------------------------------------
def _weight_fq_kernel(w_ref, o_ref, *, bits):
    o_ref[...] = _fake_quant(w_ref[...], bits)


def quantize_weight(w, bits):
    """Fake-quantize one (O, I) Linear weight.  Run once at construction."""
    O, I = w.shape
    return pl.pallas_call(
        functools.partial(_weight_fq_kernel, bits=bits),
        out_shape=jax.ShapeDtypeStruct((O, I), jnp.float32),
        in_specs=[pl.BlockSpec((O, I), lambda: (0, 0))],
        out_specs=pl.BlockSpec((O, I), lambda: (0, 0)),
    )(w.astype(jnp.float32))


# ----------------------------------------------------------------------------
# forward(): fully fused two-layer forward with activation fake-quant hooks.
# ----------------------------------------------------------------------------
def _dmsq_forward_kernel(x_ref, w1_ref, b1_ref, w2_ref, b2_ref, o_ref, *,
                         act_bits, h_valid, o_valid):
    # fc1: (B, I) . (Hp, I) contracted on I -> (B, Hp); no transpose emitted.
    h = jax.lax.dot_general(
        x_ref[...], w1_ref[...],
        dimension_numbers=(((1,), (1,)), ((), ())),
        preferred_element_type=jnp.float32) + b1_ref[...]
    # forward hook: fake-quantize fc1's output activation.  Range over the
    # real hidden lanes only; the padded lanes hit zero weight columns in fc2,
    # so their post-quant values never contribute.
    h = _fake_quant(h, act_bits, valid_cols=h_valid)
    # ReLU is not a quantized module -> hook is a no-op; plain elementwise.
    h = jnp.maximum(h, 0.0)
    # fc2: (B, Hp) . (Op, Hp) contracted on Hp -> (B, Op).
    y = jax.lax.dot_general(
        h, w2_ref[...],
        dimension_numbers=(((1,), (1,)), ((), ())),
        preferred_element_type=jnp.float32) + b2_ref[...]
    # forward hook on fc2's output.
    o_ref[...] = _fake_quant(y, act_bits, valid_cols=o_valid)


def _pad2(a, rows, cols):
    return jnp.pad(a, ((0, rows - a.shape[0]), (0, cols - a.shape[1])))


def _build_forward(B, in_f, hid, out_f, hid_p, out_p, act_bits):
    """Build a jitted forward for a fixed batch: pallas_call + un-pad slice."""
    kernel = functools.partial(
        _dmsq_forward_kernel, act_bits=act_bits, h_valid=hid, o_valid=out_f)
    call = pl.pallas_call(
        kernel,
        out_shape=jax.ShapeDtypeStruct((B, out_p), jnp.float32),
        in_specs=[
            pl.BlockSpec((B, in_f), lambda: (0, 0)),
            pl.BlockSpec((hid_p, in_f), lambda: (0, 0)),
            pl.BlockSpec((1, hid_p), lambda: (0, 0)),
            pl.BlockSpec((out_p, hid_p), lambda: (0, 0)),
            pl.BlockSpec((1, out_p), lambda: (0, 0)),
        ],
        out_specs=pl.BlockSpec((B, out_p), lambda: (0, 0)),
    )

    @jax.jit
    def fwd(x, w1_p, b1_p, w2_p, b2_p):
        y_p = call(x, w1_p, b1_p, w2_p, b2_p)
        return y_p[:, :out_f]

    return fwd


class DMSQForward:
    """DMSQQuantizer wrapping Linear(32->64) -> ReLU -> Linear(64->16)."""

    def __init__(self, key, in_f=32, hid=64, out_f=16):
        k1, k2, k3, k4 = jax.random.split(key, 4)
        self.in_f, self.hid, self.out_f = in_f, hid, out_f
        self.hid_p = max(LANE, hid)
        self.out_p = max(LANE, out_f)
        self.w1 = jax.random.normal(k1, (hid, in_f), jnp.float32) * 0.1
        self.b1 = jax.random.normal(k2, (hid,), jnp.float32) * 0.01
        self.w2 = jax.random.normal(k3, (out_f, hid), jnp.float32) * 0.1
        self.b2 = jax.random.normal(k4, (out_f,), jnp.float32) * 0.01
        # precision_map = {'fc1': 8, 'fc2': 4, 'default': 8}; the activation
        # hook falls back to 'default' (8).
        self.w_bits = {"fc1": 8, "fc2": 4}
        self.act_bits = 8
        # quantize_model(): one-time weight fake-quant, then zero-pad to
        # lane-dense shapes.  Zero rows/cols contribute exactly 0 to the
        # matmuls, so the numerics match the unpadded model.
        w1_fq = quantize_weight(self.w1, self.w_bits["fc1"])
        w2_fq = quantize_weight(self.w2, self.w_bits["fc2"])
        self.w1_fq_p = _pad2(w1_fq, self.hid_p, in_f)              # (Hp, I)
        self.w2_fq_p = _pad2(w2_fq, self.out_p, self.hid_p)        # (Op, Hp)
        self.b1_p = _pad2(self.b1.reshape(1, hid), 1, self.hid_p)  # (1, Hp)
        self.b2_p = _pad2(self.b2.reshape(1, out_f), 1, self.out_p)
        self._fwd_cache = {}

    def __call__(self, x):
        B, I = x.shape
        assert I == self.in_f
        assert B % SUBLANE == 0, "batch must be a multiple of 8 (sublane)"
        fwd = self._fwd_cache.get(B)
        if fwd is None:
            fwd = _build_forward(B, self.in_f, self.hid, self.out_f,
                                 self.hid_p, self.out_p, self.act_bits)
            self._fwd_cache[B] = fwd
        return fwd(x, self.w1_fq_p, self.b1_p, self.w2_fq_p, self.b2_p)

    # Pure-JAX reference mirroring the PyTorch semantics exactly (unpadded).
    def reference(self, x):
        def fq(t, bits):
            qmin = float(-(2 ** (bits - 1)))
            qmax = float(2 ** (bits - 1) - 1)
            t_min, t_max = jnp.min(t), jnp.max(t)
            scale = (t_max - t_min) / (qmax - qmin)
            zp = jnp.round(qmin - t_min / scale)
            q = jnp.clip(jnp.round(t / scale + zp), qmin, qmax)
            return scale * (q - zp)

        w1_fq = fq(self.w1, self.w_bits["fc1"])
        w2_fq = fq(self.w2, self.w_bits["fc2"])
        h = x @ w1_fq.T + self.b1[None, :]
        h = fq(h, self.act_bits)
        h = jnp.maximum(h, 0.0)
        y = h @ w2_fq.T + self.b2[None, :]
        return fq(y, self.act_bits)


if __name__ == "__main__":
    key = jax.random.PRNGKey(0)
    k_model, k_x = jax.random.split(key)

    model = DMSQForward(k_model, in_f=32, hid=64, out_f=16)
    x = jax.random.normal(k_x, (8, 32), jnp.float32)  # batch=8, features=32

    out = jax.block_until_ready(model(x))
    ref = model.reference(x)

    assert out.shape == (8, 16)
    assert jnp.allclose(out, ref, atol=1e-5, rtol=1e-5), "mismatch vs reference"

    print("KERNEL_OK")
</pallas_src>

<mosaic_0001>
module attributes {stable_mosaic.version = 11 : i64} {
  func.func @_weight_fq_kernel(%arg0: memref<64x32xf32, #tpu.memory_space<vmem>>, %arg1: memref<64x32xf32, #tpu.memory_space<vmem>>) attributes {dimension_semantics = [], scalar_prefetch = 0 : i64, scratch_operands = 0 : i64, tpu.core_type = #tpu.core_type<tc>} {
    %c0 = arith.constant 0 : index
    %c0_0 = arith.constant 0 : index
    %0 = vector.load %arg0[%c0, %c0_0] : memref<64x32xf32, #tpu.memory_space<vmem>>, vector<64x32xf32>
    %1 = vector.shape_cast %0 : vector<64x32xf32> to vector<1x64x32xf32>
    %cst = arith.constant dense<0x7F800000> : vector<1xf32>
    %2 = vector.multi_reduction <minimumf>, %1, %cst [1, 2] : vector<1x64x32xf32> to vector<1xf32>
    %3 = vector.shape_cast %2 : vector<1xf32> to vector<1x1x1xf32>
    %4 = vector.extract %3[0, 0, 0] : f32 from vector<1x1x1xf32>
    %5 = vector.shape_cast %0 : vector<64x32xf32> to vector<1x64x32xf32>
    %cst_1 = arith.constant dense<0xFF800000> : vector<1xf32>
    %6 = vector.multi_reduction <maximumf>, %5, %cst_1 [1, 2] : vector<1x64x32xf32> to vector<1xf32>
    %7 = vector.shape_cast %6 : vector<1xf32> to vector<1x1x1xf32>
    %8 = vector.extract %7[0, 0, 0] : f32 from vector<1x1x1xf32>
    %9 = arith.subf %8, %4 : f32
    %cst_2 = arith.constant 0.000000e+00 : f32
    %10 = arith.cmpf ogt, %9, %cst_2 : f32
    %cst_3 = arith.constant 2.550000e+02 : f32
    %11 = arith.divf %9, %cst_3 : f32
    %cst_4 = arith.constant 1.000000e+00 : f32
    %12 = arith.select %10, %11, %cst_4 : f32
    %13 = arith.divf %4, %12 : f32
    %cst_5 = arith.constant -1.280000e+02 : f32
    %14 = arith.subf %cst_5, %13 : f32
    %15 = math.roundeven %14 : f32
    %16 = vector.broadcast %12 : f32 to vector<64x32xf32>
    %17 = arith.divf %0, %16 : vector<64x32xf32>
    %18 = vector.broadcast %15 : f32 to vector<64x32xf32>
    %19 = arith.addf %17, %18 : vector<64x32xf32>
    %20 = math.roundeven %19 : vector<64x32xf32>
    %cst_6 = arith.constant -1.280000e+02 : f32
    %cst_7 = arith.constant 1.270000e+02 : f32
    %21 = vector.broadcast %cst_6 : f32 to vector<64x32xf32>
    %22 = arith.maximumf %21, %20 : vector<64x32xf32>
    %23 = vector.broadcast %cst_7 : f32 to vector<64x32xf32>
    %24 = arith.minimumf %23, %22 : vector<64x32xf32>
    %25 = vector.broadcast %15 : f32 to vector<64x32xf32>
    %26 = arith.subf %24, %25 : vector<64x32xf32>
    %27 = vector.broadcast %12 : f32 to vector<64x32xf32>
    %28 = arith.mulf %27, %26 : vector<64x32xf32>
    %cst_8 = arith.constant 0.000000e+00 : f32
    %29 = arith.cmpf ogt, %9, %cst_8 : f32
    %30 = arith.select %29, %28, %0 : vector<64x32xf32>
    %c0_9 = arith.constant 0 : index
    %c0_10 = arith.constant 0 : index
    %31 = vector.load %arg1[%c0_9, %c0_10] : memref<64x32xf32, #tpu.memory_space<vmem>>, vector<64x32xf32>
    tpu.vector_store %arg1[%c0_9, %c0_10], %30 {strides = array<i32>} : memref<64x32xf32, #tpu.memory_space<vmem>>, vector<64x32xf32>,
    return
  }
}

</mosaic_0001>

<bundles_post_ra>
// kernel: tpu_custom_call.1
= control target key start
LH: loop header
LB: loop body
LE: loop exit
PB: predicated region body
PF: predicated region fallthrough
CT: control target
= control target key end

     0   :  { %vm16_vm0 = vcmask 261120   ;;  %s346_s0 = inlined_call_operand.vmem [shape: f32[64,32], index: 0, kind: input, shape index: {}]   ;;  %s347_s1 = inlined_call_operand.vmem [shape: f32[64,32], index: 1, kind: output, shape index: {}]  }
   0x1   :  { %v195_v0 = vld [vmem:[%s346_s0] sm:$0xff]  ;;  %v200_v1 = vld [vmem:[%s346_s0 + $0x8] sm:$0xff]  ;;  %v205_v2 = vld [vmem:[%s346_s0 + $0x10] sm:$0xff] }
   0x2   :  { %v210_v3 = vld [vmem:[%s346_s0 + $0x18] sm:$0xff]  ;;  %v215_v4 = vld [vmem:[%s346_s0 + $0x20] sm:$0xff]  ;;  %v220_v5 = vld [vmem:[%s346_s0 + $0x28] sm:$0xff]  ;;  %v17_v6 = vsel %vm16_vm0, %v195_v0, inf  ;;  %v18_v7 = vsel %vm16_vm0, %v200_v1, inf  ;;  %v19_v8 = vsel %vm16_vm0, %v205_v2, inf }
   0x3   :  { %v231_v9 = vld [vmem:[%s346_s0 + $0x30] sm:$0xff]  ;;  %v236_v10 = vld [vmem:[%s346_s0 + $0x38] sm:$0xff]  ;;  %v20_v11 = vsel %vm16_vm0, %v210_v3, inf  ;;  %v21_v12 = vsel %vm16_vm0, %v215_v4, inf  ;;  %v23_v13 = vsel %vm16_vm0, %v220_v5, inf  ;;  %v41_v14 = vsel %vm16_vm0, %v195_v0, -inf }
   0x4   :  { %v22_v15 = vmin.f32 %v17_v6, %v21_v12  ;;  %v24_v16 = vmin.f32 %v18_v7, %v23_v13  ;;  %v25_v17 = vsel %vm16_vm0, %v231_v9, inf  ;;  %v27_v18 = vsel %vm16_vm0, %v236_v10, inf }
   0x5   :  { %v26_v19 = vmin.f32 %v19_v8, %v25_v17  ;;  %v28_v20 = vmin.f32 %v20_v11, %v27_v18  ;;  %v42_v21 = vsel %vm16_vm0, %v200_v1, -inf  ;;  %v43_v22 = vsel %vm16_vm0, %v205_v2, -inf }
   0x6   :  { %v29_v23 = vmin.f32 %v22_v15, %v24_v16  ;;  %v44_v24 = vsel %vm16_vm0, %v210_v3, -inf  ;;  %v45_v25 = vsel %vm16_vm0, %v215_v4, -inf  ;;  %v47_v26 = vsel %vm16_vm0, %v220_v5, -inf }
   0x7   :  { %v30_v27 = vmin.f32 %v26_v19, %v28_v20  ;;  %v46_v28 = vmax.f32 %v41_v14, %v45_v25  ;;  %v48_v29 = vmax.f32 %v42_v21, %v47_v26  ;;  %v49_v30 = vsel %vm16_vm0, %v231_v9, -inf }
   0x8   :  { %v50_v31 = vmax.f32 %v43_v22, %v49_v30  ;;  %v51_v32 = vsel %vm16_vm0, %v236_v10, -inf }
   0x9   :  { %v31_v33 = vmin.f32 %v29_v23, %v30_v27  ;;  %v52_v34 = vmax.f32 %v44_v24, %v51_v32  ;;  %v53_v35 = vmax.f32 %v46_v28, %v48_v29 }
   0xb   :  { %32 = vmin.xlane.f32.xlu0 %v31_v33  ;;  %v54_v36 = vmax.f32 %v50_v31, %v52_v34 }
   0xd   :  { %v55_v37 = vmax.f32 %v53_v35, %v54_v36 }
   0xf   :  { %56 = vmax.xlane.f32.xlu0 %v55_v37 }
  0x98   :  { %v33_v38 = vpop.xlane.xlu0 %32 }
  0x99   :  { %v34_v39 = vrot.slane %v33_v38, 4 }
  0x9b   :  { %v35_v40 = vmin.f32 %v33_v38, %v34_v39 }
  0x9c   :  { %v57_v41 = vpop.xlane.xlu0 %56 }
  0x9d   :  { %v36_v42 = vrot.slane %v35_v40, 2  ;;  %v58_v43 = vrot.slane %v57_v41, 4 }
  0x9f   :  { %v59_v44 = vmax.f32 %v57_v41, %v58_v43  ;;  %v37_v45 = vmin.f32 %v35_v40, %v36_v42 }
  0xa1   :  { %v60_v46 = vrot.slane %v59_v44, 2  ;;  %v38_v47 = vrot.slane %v37_v45, 1 }
  0xa3   :  { %v61_v48 = vmax.f32 %v59_v44, %v60_v46  ;;  %v39_v49 = vmin.f32 %v37_v45, %v38_v47 }
  0xa5   :  { %166 = vpush %v39_v49  ;;  %v62_v50 = vrot.slane %v61_v48, 1 }
  0xa7   :  { %v63_v51 = vmax.f32 %v61_v48, %v62_v50 }
  0xa9   :  { %168 = vpush %v63_v51 }
  0xd6   :  { %s167_s0 = spop %166 }
  0xda   :  { %s169_s22 = spop %168 }
  0xdb   :  { %s65_s23 = ssub.f32 %s169_s22, %s167_s0 }
  0xdd   :  { %p66_p0 = scmp.gt.f32.partialorder %s65_s23, 0.0  ;;  %s69_s24 = smul.f32 0.003921569, %s65_s23 }
  0xdf   :  { %s351_s24 = smov (!%p66_p0, %s69_s24), 1.0 }
  0xe0   :  { %v264_v52 = vstv %s351_s24  ;;  %s267_s28 = scalar_select %p66_p0, 1, 0 }
  0xe1   :  { %180 = vrcp.f32 %v264_v52 }
  0xe2   :  { %v144_v54 = vstv %s267_s28 }
  0xe3   :  { %vm278_vm1 = vcmp.eq.s32.totalorder %v144_v54, 1 }
  0xeb   :  { %v181_v53 = vpop.eup %180 }
  0xec   :  { %170 = vpush %v181_v53  ;;  %v86_v55 = vmul.f32 %v181_v53, %v195_v0  ;;  %v87_v56 = vmul.f32 %v181_v53, %v200_v1  ;;  %v88_v57 = vmul.f32 %v181_v53, %v205_v2  ;;  %v89_v58 = vmul.f32 %v181_v53, %v210_v3 }
  0xed   :  { %v90_v59 = vmul.f32 %v181_v53, %v215_v4  ;;  %v91_v60 = vmul.f32 %v181_v53, %v220_v5  ;;  %v92_v61 = vmul.f32 %v181_v53, %v231_v9  ;;  %v93_v62 = vmul.f32 %v181_v53, %v236_v10 }
 0x11d   :  { %s171_s25 = spop %170 }
 0x11e   :  { %s74_s26 = smul.f32 %s171_s25, %s167_s0 }
 0x120   :  { %s75_s27 = ssub.f32 -128.0, %s74_s26 }
 0x122   :  { %s76_s29 = scvt.f32.s32 %s75_s27  ;;  %s81_s30 = sand.u32 2147483647, %s75_s27 }
 0x123   :  { %s79_s3 = sand.u32 2147483648, %s75_s27  ;;  %p82_p1 = scmp.lt.f32.partialorder %s81_s30, 2.1474836e+09 }
 0x124   :  { %s77_s2 = scvt.s32.f32 %s76_s29 }
 0x126   :  { %s78_s4 = sand.u32 2147483647, %s77_s2 }
 0x127   :  { %s80_s5 = sor.u32 %s79_s3, %s78_s4 }
 0x128   :  { %s353_s5 = smov (!%p82_p1, %s80_s5), %s75_s27 }
 0x129   :  { %v94_v63 = vstv %s353_s5 }
 0x12a   :  { %v95_v6 = vadd.f32 %v94_v63, %v86_v55  ;;  %v96_v7 = vadd.f32 %v94_v63, %v87_v56  ;;  %v97_v8 = vadd.f32 %v94_v63, %v88_v57  ;;  %v98_v11 = vadd.f32 %v94_v63, %v89_v58 }
 0x12b   :  { %v99_v12 = vadd.f32 %v94_v63, %v90_v59  ;;  %v100_v13 = vadd.f32 %v94_v63, %v91_v60  ;;  %v101_v14 = vadd.f32 %v94_v63, %v92_v61  ;;  %v102_v15 = vadd.f32 %v94_v63, %v93_v62 }
 0x12c   :  { %v172_v16 = vround.rtne.f32 %v95_v6  ;;  %v173_v17 = vround.rtne.f32 %v96_v7  ;;  %v174_v18 = vround.rtne.f32 %v97_v8  ;;  %v175_v19 = vround.rtne.f32 %v98_v11 }
 0x12d   :  { %v176_v21 = vround.rtne.f32 %v99_v12  ;;  %v177_v22 = vround.rtne.f32 %v100_v13  ;;  %v178_v23 = vround.rtne.f32 %v101_v14  ;;  %v179_v24 = vround.rtne.f32 %v102_v15 }
 0x12e   :  { %v111_v25 = vmax.f32 %v172_v16, -128.0  ;;  %v112_v26 = vmax.f32 %v173_v17, -128.0  ;;  %v113_v27 = vmax.f32 %v174_v18, -128.0  ;;  %v114_v28 = vmax.f32 %v175_v19, -128.0 }
 0x12f   :  { %v115_v29 = vmax.f32 %v176_v21, -128.0  ;;  %v116_v30 = vmax.f32 %v177_v22, -128.0  ;;  %v117_v31 = vmax.f32 %v178_v23, -128.0  ;;  %v118_v32 = vmax.f32 %v179_v24, -128.0 }
 0x130   :  { %v119_v33 = vmin.f32 %v111_v25, 127.0  ;;  %v120_v34 = vmin.f32 %v112_v26, 127.0  ;;  %v121_v35 = vmin.f32 %v113_v27, 127.0  ;;  %v122_v36 = vmin.f32 %v114_v28, 127.0 }
 0x131   :  { %v123_v37 = vmin.f32 %v115_v29, 127.0  ;;  %v124_v38 = vmin.f32 %v116_v30, 127.0  ;;  %v125_v39 = vmin.f32 %v117_v31, 127.0  ;;  %v126_v40 = vmin.f32 %v118_v32, 127.0 }
 0x132   :  { %v127_v41 = vsub.f32 %v119_v33, %v94_v63  ;;  %v128_v42 = vsub.f32 %v120_v34, %v94_v63  ;;  %v129_v43 = vsub.f32 %v121_v35, %v94_v63  ;;  %v130_v44 = vsub.f32 %v122_v36, %v94_v63 }
 0x133   :  { %v131_v45 = vsub.f32 %v123_v37, %v94_v63  ;;  %v132_v46 = vsub.f32 %v124_v38, %v94_v63  ;;  %v133_v47 = vsub.f32 %v125_v39, %v94_v63  ;;  %v134_v48 = vsub.f32 %v126_v40, %v94_v63 }
 0x134   :  { %v135_v49 = vmul.f32 %v127_v41, %v264_v52  ;;  %v136_v50 = vmul.f32 %v128_v42, %v264_v52  ;;  %v137_v51 = vmul.f32 %v129_v43, %v264_v52  ;;  %v138_v53 = vmul.f32 %v130_v44, %v264_v52 }
 0x135   :  { %v139_v54 = vmul.f32 %v131_v45, %v264_v52  ;;  %v140_v55 = vmul.f32 %v132_v46, %v264_v52  ;;  %v141_v56 = vmul.f32 %v133_v47, %v264_v52  ;;  %v142_v57 = vmul.f32 %v134_v48, %v264_v52 }
 0x136   :  { %v146_v58 = vsel %vm278_vm1, %v135_v49, %v195_v0  ;;  %v147_v59 = vsel %vm278_vm1, %v136_v50, %v200_v1  ;;  %v148_v60 = vsel %vm278_vm1, %v137_v51, %v205_v2  ;;  %v149_v61 = vsel %vm278_vm1, %v138_v53, %v210_v3 }
 0x137   :  { %v150_v52 = vsel %vm278_vm1, %v139_v54, %v215_v4  ;;  %v151_v0 = vsel %vm278_vm1, %v140_v55, %v220_v5  ;;  %v152_v1 = vsel %vm278_vm1, %v141_v56, %v231_v9  ;;  %v153_v2 = vsel %vm278_vm1, %v142_v57, %v236_v10  ;;  %154 = vst.msk [vmem:[%s347_s1] sm:$0xff] %vm16_vm0, %v146_v58 }
 0x138   :  { %155 = vst.msk [vmem:[%s347_s1 + $0x8] sm:$0xff] %vm16_vm0, %v147_v59  ;;  %156 = vst.msk [vmem:[%s347_s1 + $0x10] sm:$0xff] %vm16_vm0, %v148_v60 }
 0x139   :  { %157 = vst.msk [vmem:[%s347_s1 + $0x18] sm:$0xff] %vm16_vm0, %v149_v61  ;;  %158 = vst.msk [vmem:[%s347_s1 + $0x20] sm:$0xff] %vm16_vm0, %v150_v52 }
 0x13a   :  { %159 = vst.msk [vmem:[%s347_s1 + $0x28] sm:$0xff] %vm16_vm0, %v151_v0  ;;  %160 = vst.msk [vmem:[%s347_s1 + $0x30] sm:$0xff] %vm16_vm0, %v152_v1 }
 0x13b   :  { %161 = vst.msk [vmem:[%s347_s1 + $0x38] sm:$0xff] %vm16_vm0, %v153_v2 }

</bundles_post_ra>
